<compile_context>
chip_gen: v7x
topology: tpu7x:2x2x1
jax: 0.10.0
libtpu: 0.0.40
codegen_flags: <defaults>
</compile_context>

<pallas_src>
import jax
import jax.numpy as jnp
from jax.experimental import pallas as pl
from jax.experimental.pallas import tpu as pltpu

LANE = 128
SUBLANE = 8


def _round_up(x, m):
    return ((x + m - 1) // m) * m


def edge_bert_kernel(q_ref, k_ref, w1a_ref, w1b_ref, b_ref, w2_ref, out_ref):
    bb, Hp = q_ref.shape
    Dp = w2_ref.shape[1]

    b1 = b_ref[0:1, :]          # (1, Dp), fp32
    b2 = b_ref[1:2, :]          # (1, Dp), fp32

    # Node term (shared by all 3 edges), bias hoisted once.
    q_part = jnp.dot(q_ref[...], w1a_ref[...], preferred_element_type=jnp.float32)
    qb = q_part + b1                                            # (bb, Dp) f32

    # One big matmul for all 3 neighbors: (3*bb, Hp) @ (Hp, Dp).
    # The reshape only merges whole (8,128) tiles (bb % 8 == 0), so it is a no-op relayout.
    k_flat = k_ref[...].reshape(3 * bb, Hp)
    nk = jnp.dot(k_flat, w1b_ref[...], preferred_element_type=jnp.float32)
    nk = nk.reshape(3, bb, Dp)

    n = jnp.maximum(nk + qb, 0.0)                               # relu per edge (f32 VPU)
    net = (n[0] + n[1] + n[2]) * (1.0 / 3.0)                    # mean over the 3 neighbors

    hidden = jnp.dot(net.astype(w2_ref.dtype), w2_ref[...],
                     preferred_element_type=jnp.float32) + b2
    out_ref[...] = jnp.maximum(hidden, 0.0).astype(out_ref.dtype)


def edge_bert_block(q, qk1, qk2, qk3, w1, b1, w2, b2, *,
                    block_b=None, matmul_dtype=None):
    """q, qk*: [B, H]. w1: [2H, D] (stored [in, out]), b1: [D], w2: [D, D], b2: [D]."""
    B, H = q.shape
    D = w2.shape[1]
    assert w1.shape == (2 * H, D) and b1.shape == (D,)
    assert w2.shape == (D, D) and b2.shape == (D,)

    # Pad feature dims to lane multiples -> lane-dense loads and (crucially) stores.
    Hp = _round_up(H, LANE)
    Dp = _round_up(D, LANE)

    # Big batch tile; pad batch so it divides (handles any B). Cap at 512 rows so
    # activations + resident weights stay well under the v7x 64 MiB VMEM budget.
    if block_b is None:
        block_b = min(512, B)
    bb = max(SUBLANE, _round_up(block_b, SUBLANE))
    Bp = _round_up(B, bb)

    out_dtype = q.dtype
    mm_dtype = matmul_dtype or q.dtype

    pad2 = lambda x, r, c: jnp.pad(x, ((0, r - x.shape[0]), (0, c - x.shape[1])))

    q_p = pad2(q, Bp, Hp).astype(mm_dtype)
    kstack = jnp.stack([qk1, qk2, qk3], axis=0)                               # (3, B, H)
    k_p = jnp.pad(kstack, ((0, 0), (0, Bp - B), (0, Hp - H))).astype(mm_dtype)

    w1a_p = pad2(w1[:H, :], Hp, Dp).astype(mm_dtype)    # acts on node features (q)
    w1b_p = pad2(w1[H:, :], Hp, Dp).astype(mm_dtype)    # acts on neighbor features (qk_i)
    w2_p = pad2(w2, Dp, Dp).astype(mm_dtype)
    b_p = jnp.stack([jnp.pad(b1, (0, Dp - D)),
                     jnp.pad(b2, (0, Dp - D))], axis=0).astype(jnp.float32)   # (2, Dp)

    grid = (Bp // bb,)
    full = lambda shape: pl.BlockSpec(shape, lambda i: (0,) * len(shape))

    out = pl.pallas_call(
        edge_bert_kernel,
        out_shape=jax.ShapeDtypeStruct((Bp, Dp), out_dtype),
        grid_spec=pl.GridSpec(
            grid=grid,
            in_specs=[
                pl.BlockSpec((bb, Hp), lambda i: (i, 0)),        # q tile
                pl.BlockSpec((3, bb, Hp), lambda i: (0, i, 0)),  # stacked neighbors tile
                full((Hp, Dp)),                                  # w1a (grid-invariant)
                full((Hp, Dp)),                                  # w1b (grid-invariant)
                full((2, Dp)),                                   # fused biases [b1; b2]
                full((Dp, Dp)),                                  # w2 (grid-invariant)
            ],
            out_specs=pl.BlockSpec((bb, Dp), lambda i: (i, 0)),
        ),
        compiler_params=pltpu.CompilerParams(
            dimension_semantics=("parallel",)),
    )(q_p, k_p, w1a_p, w1b_p, b_p, w2_p)

    return out[:B, :D]


def edge_bert_block_ref(q, qk1, qk2, qk3, w1, b1, w2, b2):
    """Pure-JAX reference mirroring the PyTorch forward."""
    node = jnp.repeat(q[:, None, :], 3, axis=1)                      # [B, 3, H]
    neigh = jnp.stack([qk1, qk2, qk3], axis=1)                       # [B, 3, H]
    edge = jnp.concatenate([node, neigh], axis=-1)                   # [B, 3, 2H]
    net = jax.nn.relu(jnp.einsum('bnk,kd->bnd', edge, w1) + b1)      # [B, 3, D]
    net = jnp.mean(net, axis=-2)                                     # [B, D]
    return jax.nn.relu(net @ w2 + b2)                                # [B, D]


def xavier_uniform(key, shape):
    fan_in, fan_out = shape
    limit = (6.0 / (fan_in + fan_out)) ** 0.5
    return jax.random.uniform(key, shape, jnp.float32, -limit, limit)


if __name__ == "__main__":
    # Small shapes consistent with the module: input_hidden_size=32, edgebert_hidden_size=32, batch=16.
    B, H, D = 16, 32, 32

    key = jax.random.PRNGKey(0)
    kq, k1, k2, k3, kw1, kb1, kw2, kb2 = jax.random.split(key, 8)

    q = jax.random.normal(kq, (B, H), jnp.float32)
    qk1 = jax.random.normal(k1, (B, H), jnp.float32)
    qk2 = jax.random.normal(k2, (B, H), jnp.float32)
    qk3 = jax.random.normal(k3, (B, H), jnp.float32)

    # linear_layer: in=2H, out=D (xavier_uniform as in weights_init); stored as [in, out].
    w1 = xavier_uniform(kw1, (2 * H, D))
    b1 = jax.random.uniform(kb1, (D,), jnp.float32, -0.1, 0.1)
    # hidden_layer: in=D, out=D.
    w2 = xavier_uniform(kw2, (D, D))
    b2 = jax.random.uniform(kb2, (D,), jnp.float32, -0.1, 0.1)

    out = edge_bert_block(q, qk1, qk2, qk3, w1, b1, w2, b2)
    out = jax.block_until_ready(out)

    ref = edge_bert_block_ref(q, qk1, qk2, qk3, w1, b1, w2, b2)
    assert out.shape == (B, D)
    assert jnp.allclose(out, ref, atol=1e-5, rtol=1e-5), "mismatch vs reference"

    print("KERNEL_OK")
</pallas_src>

<mosaic_0001>
module attributes {stable_mosaic.version = 11 : i64} {
  func.func @edge_bert_kernel(%arg0: i32, %arg1: memref<16x128xf32, #tpu.memory_space<vmem>>, %arg2: memref<3x16x128xf32, #tpu.memory_space<vmem>>, %arg3: memref<128x128xf32, #tpu.memory_space<vmem>>, %arg4: memref<128x128xf32, #tpu.memory_space<vmem>>, %arg5: memref<2x128xf32, #tpu.memory_space<vmem>>, %arg6: memref<128x128xf32, #tpu.memory_space<vmem>>, %arg7: memref<16x128xf32, #tpu.memory_space<vmem>>) attributes {dimension_semantics = [#tpu.dimension_semantics<parallel>], iteration_bounds = array<i64: 1>, scalar_prefetch = 0 : i64, scratch_operands = 0 : i64, tpu.core_type = #tpu.core_type<tc>, window_params = [{transform_indices = @transform_0, window_bounds = array<i64: 16, 128>}, {transform_indices = @transform_1, window_bounds = array<i64: 3, 16, 128>}, {pipeline_mode = #tpu.pipeline_mode<synchronous>, transform_indices = @transform_2, window_bounds = array<i64: 128, 128>}, {pipeline_mode = #tpu.pipeline_mode<synchronous>, transform_indices = @transform_3, window_bounds = array<i64: 128, 128>}, {pipeline_mode = #tpu.pipeline_mode<synchronous>, transform_indices = @transform_4, window_bounds = array<i64: 2, 128>}, {pipeline_mode = #tpu.pipeline_mode<synchronous>, transform_indices = @transform_5, window_bounds = array<i64: 128, 128>}, {transform_indices = @transform_6, window_bounds = array<i64: 16, 128>}]} {
    %c0 = arith.constant 0 : index
    %c0_0 = arith.constant 0 : index
    %0 = vector.load %arg5[%c0, %c0_0] : memref<2x128xf32, #tpu.memory_space<vmem>>, vector<1x128xf32>
    %c1 = arith.constant 1 : index
    %c0_1 = arith.constant 0 : index
    %1 = vector.load %arg5[%c1, %c0_1] : memref<2x128xf32, #tpu.memory_space<vmem>>, vector<1x128xf32>
    %c0_2 = arith.constant 0 : index
    %c0_3 = arith.constant 0 : index
    %2 = vector.load %arg1[%c0_2, %c0_3] : memref<16x128xf32, #tpu.memory_space<vmem>>, vector<16x128xf32>
    %c0_4 = arith.constant 0 : index
    %c0_5 = arith.constant 0 : index
    %3 = vector.load %arg3[%c0_4, %c0_5] : memref<128x128xf32, #tpu.memory_space<vmem>>, vector<128x128xf32>
    %cst = arith.constant dense<0.000000e+00> : vector<16x128xf32>
    %4 = tpu.matmul %2, %3, %cst {dimension_numbers = #tpu.dot_dimension_numbers<[1], [0], [0], [1], [0, 0, 1, 1], [], []>} : vector<16x128xf32>, vector<128x128xf32>, vector<16x128xf32> -> vector<16x128xf32>
    %5 = vector.broadcast %0 : vector<1x128xf32> to vector<16x128xf32>
    %6 = arith.addf %4, %5 : vector<16x128xf32>
    %c0_6 = arith.constant 0 : index
    %c0_7 = arith.constant 0 : index
    %c0_8 = arith.constant 0 : index
    %7 = vector.load %arg2[%c0_6, %c0_7, %c0_8] : memref<3x16x128xf32, #tpu.memory_space<vmem>>, vector<3x16x128xf32>
    %8 = vector.shape_cast %7 : vector<3x16x128xf32> to vector<48x128xf32>
    %c0_9 = arith.constant 0 : index
    %c0_10 = arith.constant 0 : index
    %9 = vector.load %arg4[%c0_9, %c0_10] : memref<128x128xf32, #tpu.memory_space<vmem>>, vector<128x128xf32>
    %cst_11 = arith.constant dense<0.000000e+00> : vector<48x128xf32>
    %10 = tpu.matmul %8, %9, %cst_11 {dimension_numbers = #tpu.dot_dimension_numbers<[1], [0], [0], [1], [0, 0, 1, 1], [], []>} : vector<48x128xf32>, vector<128x128xf32>, vector<48x128xf32> -> vector<48x128xf32>
    %11 = vector.shape_cast %10 : vector<48x128xf32> to vector<3x16x128xf32>
    %12 = vector.shape_cast %6 : vector<16x128xf32> to vector<1x16x128xf32>
    %13 = vector.broadcast %12 : vector<1x16x128xf32> to vector<3x16x128xf32>
    %14 = arith.addf %11, %13 : vector<3x16x128xf32>
    %cst_12 = arith.constant 0.000000e+00 : f32
    %15 = vector.broadcast %cst_12 : f32 to vector<3x16x128xf32>
    %16 = arith.maximumf %14, %15 : vector<3x16x128xf32>
    %17 = vector.extract_strided_slice %16 {offsets = [0, 0, 0], sizes = [1, 16, 128], strides = [1, 1, 1]} : vector<3x16x128xf32> to vector<1x16x128xf32>
    %18 = vector.shape_cast %17 : vector<1x16x128xf32> to vector<16x128xf32>
    %19 = vector.extract_strided_slice %16 {offsets = [1, 0, 0], sizes = [1, 16, 128], strides = [1, 1, 1]} : vector<3x16x128xf32> to vector<1x16x128xf32>
    %20 = vector.shape_cast %19 : vector<1x16x128xf32> to vector<16x128xf32>
    %21 = arith.addf %18, %20 : vector<16x128xf32>
    %22 = vector.extract_strided_slice %16 {offsets = [2, 0, 0], sizes = [1, 16, 128], strides = [1, 1, 1]} : vector<3x16x128xf32> to vector<1x16x128xf32>
    %23 = vector.shape_cast %22 : vector<1x16x128xf32> to vector<16x128xf32>
    %24 = arith.addf %21, %23 : vector<16x128xf32>
    %cst_13 = arith.constant 0.333333343 : f32
    %25 = vector.broadcast %cst_13 : f32 to vector<16x128xf32>
    %26 = arith.mulf %24, %25 : vector<16x128xf32>
    %c0_14 = arith.constant 0 : index
    %c0_15 = arith.constant 0 : index
    %27 = vector.load %arg6[%c0_14, %c0_15] : memref<128x128xf32, #tpu.memory_space<vmem>>, vector<128x128xf32>
    %cst_16 = arith.constant dense<0.000000e+00> : vector<16x128xf32>
    %28 = tpu.matmul %26, %27, %cst_16 {dimension_numbers = #tpu.dot_dimension_numbers<[1], [0], [0], [1], [0, 0, 1, 1], [], []>} : vector<16x128xf32>, vector<128x128xf32>, vector<16x128xf32> -> vector<16x128xf32>
    %29 = vector.broadcast %1 : vector<1x128xf32> to vector<16x128xf32>
    %30 = arith.addf %28, %29 : vector<16x128xf32>
    %cst_17 = arith.constant 0.000000e+00 : f32
    %31 = vector.broadcast %cst_17 : f32 to vector<16x128xf32>
    %32 = arith.maximumf %30, %31 : vector<16x128xf32>
    %c0_18 = arith.constant 0 : index
    %c0_19 = arith.constant 0 : index
    %33 = vector.load %arg7[%c0_18, %c0_19] : memref<16x128xf32, #tpu.memory_space<vmem>>, vector<16x128xf32>
    tpu.vector_store %arg7[%c0_18, %c0_19], %32 {strides = array<i32>} : memref<16x128xf32, #tpu.memory_space<vmem>>, vector<16x128xf32>,
    return
  }
  func.func @transform_0(%arg0: i32) -> (i32, i32) {
    %c0_i32 = arith.constant 0 : i32
    %c0_i32_0 = arith.constant 0 : i32
    return %arg0, %c0_i32 : i32, i32
  }
  func.func @transform_1(%arg0: i32) -> (i32, i32, i32) {
    %c0_i32 = arith.constant 0 : i32
    %c0_i32_0 = arith.constant 0 : i32
    %c0_i32_1 = arith.constant 0 : i32
    return %c0_i32, %arg0, %c0_i32_0 : i32, i32, i32
  }
  func.func @transform_2(%arg0: i32) -> (i32, i32) {
    %c0_i32 = arith.constant 0 : i32
    %c0_i32_0 = arith.constant 0 : i32
    %c0_i32_1 = arith.constant 0 : i32
    return %c0_i32, %c0_i32_0 : i32, i32
  }
  func.func @transform_3(%arg0: i32) -> (i32, i32) {
    %c0_i32 = arith.constant 0 : i32
    %c0_i32_0 = arith.constant 0 : i32
    %c0_i32_1 = arith.constant 0 : i32
    return %c0_i32, %c0_i32_0 : i32, i32
  }
  func.func @transform_4(%arg0: i32) -> (i32, i32) {
    %c0_i32 = arith.constant 0 : i32
    %c0_i32_0 = arith.constant 0 : i32
    %c0_i32_1 = arith.constant 0 : i32
    return %c0_i32, %c0_i32_0 : i32, i32
  }
  func.func @transform_5(%arg0: i32) -> (i32, i32) {
    %c0_i32 = arith.constant 0 : i32
    %c0_i32_0 = arith.constant 0 : i32
    %c0_i32_1 = arith.constant 0 : i32
    return %c0_i32, %c0_i32_0 : i32, i32
  }
  func.func @transform_6(%arg0: i32) -> (i32, i32) {
    %c0_i32 = arith.constant 0 : i32
    %c0_i32_0 = arith.constant 0 : i32
    return %arg0, %c0_i32 : i32, i32
  }
}

</mosaic_0001>

<bundles_post_ra>
// kernel: tpu_custom_call.1
= control target key start
LH: loop header
LB: loop body
LE: loop exit
PB: predicated region body
PF: predicated region fallthrough
CT: control target
= control target key end

     0   :  { %11 = vsyncpa [#allocation3], 0  ;;  %s1012_s0 = inlined_call_operand.hbm [shape: f32[16,128], index: 0, kind: input, shape index: {}]   ;;  %s1013_s1 = inlined_call_operand.hbm [shape: f32[3,16,128], index: 1, kind: input, shape index: {}]   ;;  %s1014_s2 = inlined_call_operand.hbm [shape: f32[128,128], index: 2, kind: input, shape index: {}]   ;;  %s1015_s3 = inlined_call_operand.hbm [shape: f32[128,128], index: 3, kind: input, shape index: {}]   ;;  %s1016_s4 = inlined_call_operand.vmem [shape: f32[2,128], index: 4, kind: input, shape index: {}]   ;;  %s1017_s5 = inlined_call_operand.hbm [shape: f32[128,128], index: 5, kind: input, shape index: {}]   ;;  %s1018_s6 = inlined_call_operand.hbm [shape: f32[16,128], index: 6, kind: output, shape index: {}]  }
   0x1   :  { %12 = vsyncpa [#allocation6], 0 }
   0x2   :  { %13 = vsyncpa [#allocation9], 0 }
   0x3   :  { %14 = vsyncpa [#allocation4], 0  ;;  %s859_s21 = smov [#allocation5]   ;;  %s860_s23 = smov [#allocation8]  }
   0x4   :  { %s32_s22 = sshll.u32 %s859_s21, 4  ;;  %s56_s24 = sshll.u32 %s860_s23, 4  ;;  %s33_s22 = int_to_ptr.vmem [resolvable:$true] %s32_s22  ;;  %s902_s24 = int_to_ptr.vmem [resolvable:$true] %s56_s24 }
   0x5   :  { %s719_s27 = scalar_lea.hbm %s1013_s1, 768 }
   0x6   :  { %p720_p0 = scmp.ne.s32.totalorder %s1013_s1, %s719_s27  ;;  %p723_p1 = scmp.lt.u32.totalorder %s719_s27, %s1013_s1 }
   0x8   :  { %p725_p2 = pnand %p723_p1, %p720_p0 }
   0xa   :  { %728 = shalt.err (!%p725_p2)
}
   0xb   :  { %s729_s8 = scalar_lea.vmem %s33_s22, 768  ;;  %p734_p4 = scmp.lt.s32.totalorder %s33_s22, %s33_s22 }
   0xc   :  { %p730_p3 = scmp.ne.s32.totalorder %s33_s22, %s729_s8  ;;  %p735_p5 = scmp.lt.s32.totalorder %s729_s8, %s729_s8 }
   0xe   :  { %p736_p6 = por %p735_p5, %p734_p4 }
  0x10   :  { %p737_p7 = pnand %p736_p6, %p730_p3 }
  0x12   :  { %740 = shalt.err (!%p737_p7)
}
  0x13   :  { %s861_s9 = smov 128   ;;  %s862_s10 = smov 8  }
  0x14   :  { %38 = dma.hbm_to_vmem [thread:$0]  %s1013_s1, 768, %s33_s22, [#allocation6], %s861_s9, %s861_s9, %s862_s10  }
  0x15   :  { %s741_s15 = scalar_lea.hbm %s1015_s3, 2048 }
  0x16   :  { %p742_p8 = scmp.ne.s32.totalorder %s1015_s3, %s741_s15  ;;  %p745_p9 = scmp.lt.u32.totalorder %s741_s15, %s1015_s3 }
  0x18   :  { %p747_p10 = pnand %p745_p9, %p742_p8 }
  0x1a   :  { %750 = shalt.err (!%p747_p10)
}
  0x1b   :  { %s751_s20 = scalar_lea.vmem %s902_s24, 2048  ;;  %p756_p12 = scmp.lt.s32.totalorder %s902_s24, %s902_s24 }
  0x1c   :  { %p752_p11 = scmp.ne.s32.totalorder %s902_s24, %s751_s20  ;;  %p757_p13 = scmp.lt.s32.totalorder %s751_s20, %s751_s20 }
  0x1e   :  { %p758_p0 = por %p757_p13, %p756_p12 }
  0x20   :  { %p759_p1 = pnand %p758_p0, %p752_p11 }
  0x22   :  { %762 = shalt.err (!%p759_p1)
}
  0x23   :  { %62 = dma.hbm_to_vmem [thread:$0]  %s1015_s3, 2048, %s902_s24, [#allocation9], %s861_s9, %s861_s9, %s862_s10  }
  0x24   :  { %s863_s22 = smov [#allocation2]   ;;  %s864_s25 = smov [#allocation7]  }
  0x25   :  { %s20_s23 = sshll.u32 %s863_s22, 4  ;;  %s44_s26 = sshll.u32 %s864_s25, 4  ;;  %s21_s23 = int_to_ptr.vmem [resolvable:$true] %s20_s23  ;;  %s939_s26 = int_to_ptr.vmem [resolvable:$true] %s44_s26 }
  0x26   :  { %s763_s29 = scalar_lea.hbm %s1012_s0, 256 }
  0x27   :  { %p764_p2 = scmp.ne.s32.totalorder %s1012_s0, %s763_s29  ;;  %p767_p3 = scmp.lt.u32.totalorder %s763_s29, %s1012_s0 }
  0x29   :  { %p769_p4 = pnand %p767_p3, %p764_p2 }
  0x2b   :  { %772 = shalt.err (!%p769_p4)
}
  0x2c   :  { %s773_s3 = scalar_lea.vmem %s21_s23, 256  ;;  %p778_p6 = scmp.lt.s32.totalorder %s21_s23, %s21_s23 }
  0x2d   :  { %p774_p5 = scmp.ne.s32.totalorder %s21_s23, %s773_s3  ;;  %p779_p7 = scmp.lt.s32.totalorder %s773_s3, %s773_s3 }
  0x2f   :  { %p780_p8 = por %p779_p7, %p778_p6 }
  0x31   :  { %p781_p9 = pnand %p780_p8, %p774_p5 }
  0x33   :  { %784 = shalt.err (!%p781_p9)
}
  0x34   :  { %26 = dma.hbm_to_vmem [thread:$0]  %s1012_s0, 256, %s21_s23, [#allocation3], %s861_s9, %s861_s9, %s862_s10  }
  0x35   :  { %s785_s15 = scalar_lea.hbm %s1014_s2, 2048 }
  0x36   :  { %p786_p10 = scmp.ne.s32.totalorder %s1014_s2, %s785_s15  ;;  %p789_p11 = scmp.lt.u32.totalorder %s785_s15, %s1014_s2 }
  0x38   :  { %p791_p12 = pnand %p789_p11, %p786_p10 }
  0x3a   :  { %794 = shalt.err (!%p791_p12)
}
  0x3b   :  { %s795_s20 = scalar_lea.vmem %s939_s26, 2048  ;;  %p800_p0 = scmp.lt.s32.totalorder %s939_s26, %s939_s26 }
  0x3c   :  { %p796_p13 = scmp.ne.s32.totalorder %s939_s26, %s795_s20  ;;  %p801_p1 = scmp.lt.s32.totalorder %s795_s20, %s795_s20 }
  0x3e   :  { %p802_p2 = por %p801_p1, %p800_p0 }
  0x40   :  { %p803_p3 = pnand %p802_p2, %p796_p13 }
  0x42   :  { %806 = shalt.err (!%p803_p3)
}
  0x43   :  { %50 = dma.hbm_to_vmem [thread:$0]  %s1014_s2, 2048, %s939_s26, [#allocation6], %s861_s9, %s861_s9, %s862_s10  }
  0x44   :  { %s865_s21 = smov [#allocation10]   ;;  %s807_s27 = scalar_lea.hbm %s1017_s5, 2048 }
  0x45   :  { %s70_s22 = sshll.u32 %s865_s21, 4  ;;  %p808_p4 = scmp.ne.s32.totalorder %s1017_s5, %s807_s27  ;;  %s71_s22 = int_to_ptr.vmem [resolvable:$true] %s70_s22 }
  0x46   :  { %p811_p5 = scmp.lt.u32.totalorder %s807_s27, %s1017_s5 }
  0x48   :  { %p813_p6 = pnand %p811_p5, %p808_p4 }
  0x4a   :  { %816 = shalt.err (!%p813_p6)
}
  0x4b   :  { %s817_s8 = scalar_lea.vmem %s71_s22, 2048  ;;  %p822_p8 = scmp.lt.s32.totalorder %s71_s22, %s71_s22 }
  0x4c   :  { %p818_p7 = scmp.ne.s32.totalorder %s71_s22, %s817_s8  ;;  %p823_p9 = scmp.lt.s32.totalorder %s817_s8, %s817_s8 }
  0x4e   :  { %p824_p10 = por %p823_p9, %p822_p8 }
  0x50   :  { %p825_p11 = pnand %p824_p10, %p818_p7 }
  0x52   :  { %828 = shalt.err (!%p825_p11)
}
  0x53   :  { %76 = dma.hbm_to_vmem [thread:$0]  %s1017_s5, 2048, %s71_s22, [#allocation9], %s861_s9, %s861_s9, %s862_s10  }
  0x54   :  { %851 = dma.done.wait [#allocation3], 256  }
  0x55   :  { %852 = vsyncadd [#allocation3], 4294967040 }
  0x56   :  { %853 = dma.done.wait [#allocation6], 2816  }
  0x57   :  { %854 = vsyncadd [#allocation6], 4294964480 }
  0x58   :  { %855 = dma.done.wait [#allocation9], 4096  }
  0x59   :  { %856 = vsyncadd [#allocation9], 4294963200  ;;  %v96_v0 = vld [vmem:[#allocation7] sm:$0xff]  ;;  %v97_v1 = vld [vmem:[#allocation7 + $0x8] sm:$0xff]  ;;  %s866_s12 = smov [#allocation11]  }
  0x5a   :  { %v197_v2 = vld [vmem:[#allocation8] sm:$0xff]  ;;  %v615_v3 = vpack.c.bf16 %v97_v1, %v96_v0  ;;  %v198_v4 = vld [vmem:[#allocation8 + $0x8] sm:$0xff]  ;;  %v98_v5 = vld [vmem:[#allocation7 + $0x10] sm:$0xff]  ;;  %s430_s13 = sshll.u32 %s866_s12, 4  ;;  %s431_s13 = int_to_ptr.vmem [resolvable:$true] %s430_s13 }
  0x5b   :  { %v99_v6 = vld [vmem:[#allocation7 + $0x18] sm:$0xff]  ;;  %v647_v7 = vpack.c.bf16 %v198_v4, %v197_v2  ;;  %v199_v9 = vld [vmem:[#allocation8 + $0x10] sm:$0xff]  ;;  %v100_v11 = vld [vmem:[#allocation7 + $0x20] sm:$0xff]  ;;  %s829_s14 = scalar_lea.vmem %s431_s13, 256  ;;  %p834_p13 = scmp.lt.s32.totalorder %s431_s13, %s431_s13 }
  0x5c   :  { %v619_v8 = vpack.c.bf16 %v99_v6, %v98_v5  ;;  %v200_v10 = vld [vmem:[#allocation8 + $0x18] sm:$0xff]  ;;  %616 = vmatprep.subr.bf16.mxu0 %v615_v3  ;;  %v101_v13 = vld [vmem:[#allocation7 + $0x28] sm:$0xff]  ;;  %v201_v14 = vld [vmem:[#allocation8 + $0x20] sm:$0xff]  ;;  %p830_p12 = scmp.ne.s32.totalorder %s431_s13, %s829_s14  ;;  %p835_p0 = scmp.lt.s32.totalorder %s829_s14, %s829_s14 }
  0x5d   :  { %v651_v12 = vpack.c.bf16 %v200_v10, %v199_v9  ;;  %v202_v15 = vld [vmem:[#allocation8 + $0x28] sm:$0xff]  ;;  %648 = vmatprep.subr.bf16.mxu1 %v647_v7  ;;  %618 = vmatpush3.bf16.msra.mxu0 %v615_v3  ;;  %v623_v16 = vpack.c.bf16 %v101_v13, %v100_v11  ;;  %v102_v18 = vld [vmem:[#allocation7 + $0x30] sm:$0xff]  ;;  %v103_v19 = vld [vmem:[#allocation7 + $0x38] sm:$0xff] }
  0x5e   :  { %650 = vmatpush3.bf16.msra.mxu1 %v647_v7  ;;  %620 = vmatprep.subr.bf16.mxu0 %v619_v8  ;;  %v655_v17 = vpack.c.bf16 %v202_v15, %v201_v14  ;;  %v203_v20 = vld [vmem:[#allocation8 + $0x30] sm:$0xff]  ;;  %v204_v21 = vld [vmem:[#allocation8 + $0x38] sm:$0xff]  ;;  %v627_v22 = vpack.c.bf16 %v103_v19, %v102_v18  ;;  %v104_v24 = vld [vmem:[#allocation7 + $0x40] sm:$0xff]  ;;  %p836_p1 = por %p835_p0, %p834_p13 }
  0x5f   :  { %652 = vmatprep.subr.bf16.mxu1 %v651_v12  ;;  %v659_v23 = vpack.c.bf16 %v204_v21, %v203_v20  ;;  %v105_v25 = vld [vmem:[#allocation7 + $0x48] sm:$0xff]  ;;  %v94_v26 = vld [vmem:[#allocation2] sm:$0xff]  ;;  %v191_v29 = vld [vmem:[#allocation5] sm:$0xff] }
  0x60   :  { %v205_v27 = vld [vmem:[#allocation8 + $0x40] sm:$0xff]  ;;  %v206_v28 = vld [vmem:[#allocation8 + $0x48] sm:$0xff]  ;;  %536 = vmatprep.mubr.f32.mxu0 %v94_v26  ;;  %571 = vmatprep.mubr.f32.mxu1 %v191_v29  ;;  %v631_v30 = vpack.c.bf16 %v105_v25, %v104_v24  ;;  %v106_v32 = vld [vmem:[#allocation7 + $0x50] sm:$0xff]  ;;  %p837_p2 = pnand %p836_p1, %p830_p12 }
  0x61   :  { %622 = vmatpush3.bf16.msra.mxu0 %v619_v8  ;;  %v663_v31 = vpack.c.bf16 %v206_v28, %v205_v27  ;;  %v107_v33 = vld [vmem:[#allocation7 + $0x58] sm:$0xff]  ;;  %v207_v34 = vld [vmem:[#allocation8 + $0x50] sm:$0xff]  ;;  %v108_v38 = vld [vmem:[#allocation7 + $0x60] sm:$0xff] }
  0x62   :  { %654 = vmatpush3.bf16.msra.mxu1 %v651_v12  ;;  %624 = vmatprep.subr.bf16.mxu0 %v623_v16  ;;  %v208_v35 = vld [vmem:[#allocation8 + $0x58] sm:$0xff]  ;;  %v635_v36 = vpack.c.bf16 %v107_v33, %v106_v32  ;;  %v109_v39 = vld [vmem:[#allocation7 + $0x68] sm:$0xff]  ;;  %v209_v40 = vld [vmem:[#allocation8 + $0x60] sm:$0xff] }
  0x63   :  { %656 = vmatprep.subr.bf16.mxu1 %v655_v17  ;;  %v667_v37 = vpack.c.bf16 %v208_v35, %v207_v34  ;;  %v210_v41 = vld [vmem:[#allocation8 + $0x68] sm:$0xff]  ;;  %v639_v42 = vpack.c.bf16 %v109_v39, %v108_v38  ;;  %v110_v44 = vld [vmem:[#allocation7 + $0x70] sm:$0xff]  ;;  %v111_v45 = vld [vmem:[#allocation7 + $0x78] sm:$0xff] }
  0x64   :  { %v671_v43 = vpack.c.bf16 %v210_v41, %v209_v40  ;;  %v211_v46 = vld [vmem:[#allocation8 + $0x70] sm:$0xff]  ;;  %v212_v47 = vld [vmem:[#allocation8 + $0x78] sm:$0xff]  ;;  %v643_v48 = vpack.c.bf16 %v111_v45, %v110_v44  ;;  %v326_v50 = vld [vmem:[#allocation10] sm:$0xff] }
  0x65   :  { %626 = vmatpush3.bf16.msra.mxu0 %v623_v16  ;;  %v675_v49 = vpack.c.bf16 %v212_v47, %v211_v46  ;;  %v327_v51 = vld [vmem:[#allocation10 + $0x8] sm:$0xff]  ;;  %v328_v53 = vld [vmem:[#allocation10 + $0x10] sm:$0xff]  ;;  %v329_v54 = vld [vmem:[#allocation10 + $0x18] sm:$0xff] }
  0x66   :  { %658 = vmatpush3.bf16.msra.mxu1 %v655_v17  ;;  %628 = vmatprep.subr.bf16.mxu0 %v627_v22  ;;  %v679_v52 = vpack.c.bf16 %v327_v51, %v326_v50  ;;  %v95_v55 = vld [vmem:[#allocation2 + $0x8] sm:$0xff]  ;;  %v192_v56 = vld [vmem:[#allocation5 + $0x8] sm:$0xff]  ;;  %v683_v57 = vpack.c.bf16 %v329_v54, %v328_v53  ;;  %v193_v58 = vld [vmem:[#allocation5 + $0x10] sm:$0xff] }
  0x67   :  { %660 = vmatprep.subr.bf16.mxu1 %v659_v23  ;;  %v330_v59 = vld [vmem:[#allocation10 + $0x20] sm:$0xff]  ;;  %v331_v60 = vld [vmem:[#allocation10 + $0x28] sm:$0xff]  ;;  %v195_v63 = vld [vmem:[#allocation5 + $0x20] sm:$0xff] }
  0x68   :  { %v194_v61 = vld [vmem:[#allocation5 + $0x18] sm:$0xff]  ;;  %v687_v62 = vpack.c.bf16 %v331_v60, %v330_v59  ;;  %v332_v0 = vld [vmem:[#allocation10 + $0x30] sm:$0xff]  ;;  %v333_v1 = vld [vmem:[#allocation10 + $0x38] sm:$0xff] }
  0x69   :  { %630 = vmatpush3.bf16.msra.mxu0 %v627_v22  ;;  %v196_v2 = vld [vmem:[#allocation5 + $0x28] sm:$0xff]  ;;  %v691_v3 = vpack.c.bf16 %v333_v1, %v332_v0  ;;  %v334_v4 = vld [vmem:[#allocation10 + $0x40] sm:$0xff]  ;;  %v335_v5 = vld [vmem:[#allocation10 + $0x48] sm:$0xff] }
  0x6a   :  { %662 = vmatpush3.bf16.msra.mxu1 %v659_v23  ;;  %632 = vmatprep.subr.bf16.mxu0 %v631_v30  ;;  %v695_v6 = vpack.c.bf16 %v335_v5, %v334_v4  ;;  %v336_v7 = vld [vmem:[#allocation10 + $0x50] sm:$0xff]  ;;  %v337_v8 = vld [vmem:[#allocation10 + $0x58] sm:$0xff]  ;;  %v338_v10 = vld [vmem:[#allocation10 + $0x60] sm:$0xff] }
  0x6b   :  { %664 = vmatprep.subr.bf16.mxu1 %v663_v31  ;;  %v699_v9 = vpack.c.bf16 %v337_v8, %v336_v7  ;;  %v339_v11 = vld [vmem:[#allocation10 + $0x68] sm:$0xff]  ;;  %v340_v13 = vld [vmem:[#allocation10 + $0x70] sm:$0xff]  ;;  %v341_v14 = vld [vmem:[#allocation10 + $0x78] sm:$0xff] }
  0x6c   :  { %v703_v12 = vpack.c.bf16 %v339_v11, %v338_v10  ;;  %v707_v15 = vpack.c.bf16 %v341_v14, %v340_v13  ;;  %v444_v16 = vld [vmem:[%s1016_s4] ss:$0 sm:$0xff]  ;;  %v445_v45 = vld [vmem:[%s1016_s4 + $0x1] ss:$0 sm:$0xff] }
  0x6d   :  { %634 = vmatpush3.bf16.msra.mxu0 %v631_v30 }
  0x6e   :  { %666 = vmatpush3.bf16.msra.mxu1 %v663_v31  ;;  %636 = vmatprep.subr.bf16.mxu0 %v635_v36 }
  0x6f   :  { %668 = vmatprep.subr.bf16.mxu1 %v667_v37 }
  0x71   :  { %638 = vmatpush3.bf16.msra.mxu0 %v635_v36 }
  0x72   :  { %670 = vmatpush3.bf16.msra.mxu1 %v667_v37  ;;  %640 = vmatprep.subr.bf16.mxu0 %v639_v42 }
  0x73   :  { %672 = vmatprep.subr.bf16.mxu1 %v671_v43 }
  0x75   :  { %642 = vmatpush3.bf16.msra.mxu0 %v639_v42 }
  0x76   :  { %674 = vmatpush3.bf16.msra.mxu1 %v671_v43  ;;  %644 = vmatprep.subr.bf16.mxu0 %v643_v48 }
  0x77   :  { %676 = vmatprep.subr.bf16.mxu1 %v675_v49 }
  0x79   :  { %646 = vmatpush3.bf16.msra.mxu0 %v643_v48 }
  0x7a   :  { %678 = vmatpush3.bf16.msra.mxu1 %v675_v49  ;;  %680 = vmatprep.subr.bf16.mxu0 %v679_v52 }
  0x7c   :  { %537 = vmatmul.mubr.f32.vlgmr.msra.gmra.mrb[0].mxu0 %v95_v55 }
  0x7d   :  { %572 = vmatmul.mubr.f32.vlgmr.msra.gmra.mrb[0].mxu1 %v192_v56  ;;  %682 = vmatpush3.bf16.msra.mxu0 %v679_v52 }
  0x7e   :  { %574 = vmatprep.mubr.f32.mxu1 %v193_v58  ;;  %684 = vmatprep.subr.bf16.mxu0 %v683_v57 }
  0x81   :  { %575 = vmatmul.mubr.f32.gmra.mrb[2].mxu1 %v194_v61  ;;  %686 = vmatpush3.bf16.msra.mxu0 %v683_v57 }
  0x82   :  { %577 = vmatprep.mubr.f32.mxu1 %v195_v63  ;;  %688 = vmatprep.subr.bf16.mxu0 %v687_v62 }
  0x85   :  { %578 = vmatmul.mubr.f32.gmra.mrb[4].mxu1 %v196_v2  ;;  %690 = vmatpush3.bf16.msra.mxu0 %v687_v62 }
  0x86   :  { %692 = vmatprep.subr.bf16.mxu0 %v691_v3 }
  0x89   :  { %694 = vmatpush3.bf16.msra.mxu0 %v691_v3 }
  0x8a   :  { %696 = vmatprep.subr.bf16.mxu0 %v695_v6 }
  0x8d   :  { %698 = vmatpush3.bf16.msra.mxu0 %v695_v6 }
  0x8e   :  { %700 = vmatprep.subr.bf16.mxu0 %v699_v9 }
  0x91   :  { %702 = vmatpush3.bf16.msra.mxu0 %v699_v9 }
  0x92   :  { %704 = vmatprep.subr.bf16.mxu0 %v703_v12 }
  0x95   :  { %706 = vmatpush3.bf16.msra.mxu0 %v703_v12 }
  0x96   :  { %708 = vmatprep.subr.bf16.mxu0 %v707_v15 }
  0x99   :  { %710 = vmatpush3.bf16.msra.mxu0 %v707_v15 }
 0x14f   :  { %v538_v17 = vpop.f32.mrb[0].mxu0 }
 0x150   :  { %v188_v18 = vadd.f32 %v538_v17, %v444_v16  ;;  %v573_v19 = vpop.f32.mrb[0].mxu1  ;;  %v182_v20 = vpop.f32.mrb[1].mxu0 }
 0x151   :  { %v183_v21 = vadd.f32 %v444_v16, %v182_v20  ;;  %v279_v22 = vpop.f32.mrb[1].mxu1 }
 0x152   :  { %v309_v23 = vadd.f32 %v573_v19, %v188_v18 }
 0x153   :  { %v308_v24 = vadd.f32 %v279_v22, %v183_v21 }
 0x154   :  { %v576_v25 = vpop.f32.mrb[2].mxu1  ;;  %v315_v29 = vmax.f32 %v309_v23, 0.0 }
 0x155   :  { %v311_v26 = vadd.f32 %v576_v25, %v188_v18  ;;  %v289_v27 = vpop.f32.mrb[3].mxu1  ;;  %v314_v31 = vmax.f32 %v308_v24, 0.0 }
 0x156   :  { %v310_v28 = vadd.f32 %v289_v27, %v183_v21 }
 0x157   :  { %v317_v30 = vmax.f32 %v311_v26, 0.0 }
 0x158   :  { %v316_v32 = vmax.f32 %v310_v28, 0.0  ;;  %v579_v33 = vpop.f32.mrb[4].mxu1 }
 0x159   :  { %v321_v34 = vadd.f32 %v317_v30, %v315_v29  ;;  %v313_v35 = vadd.f32 %v579_v33, %v188_v18  ;;  %v299_v36 = vpop.f32.mrb[5].mxu1 }
 0x15a   :  { %v320_v37 = vadd.f32 %v316_v32, %v314_v31  ;;  %v312_v38 = vadd.f32 %v299_v36, %v183_v21 }
 0x15b   :  { %v319_v39 = vmax.f32 %v313_v35, 0.0 }
 0x15c   :  { %v318_v40 = vmax.f32 %v312_v38, 0.0 }
 0x15d   :  { %v323_v41 = vadd.f32 %v321_v34, %v319_v39 }
 0x15e   :  { %v322_v42 = vadd.f32 %v320_v37, %v318_v40 }
 0x15f   :  { %v325_v44 = vmul.f32 0.33333334, %v323_v41 }
 0x160   :  { %v324_v43 = vmul.f32 0.33333334, %v322_v42 }
 0x162   :  { %612 = vmatprep.mubr.f32.mxu0 %v324_v43 }
 0x163   :  { %613 = vmatmul.mubr.f32.vlgmr.msra.gmra.mrb[2].mxu0 %v325_v44 }
 0x236   :  { %v614_v46 = vpop.f32.mrb[2].mxu0 }
 0x237   :  { %v418_v47 = vadd.f32 %v614_v46, %v445_v45  ;;  %v412_v48 = vpop.f32.mrb[3].mxu0 }
 0x238   :  { %v413_v49 = vadd.f32 %v445_v45, %v412_v48 }
 0x239   :  { %v422_v50 = vmax.f32 %v418_v47, 0.0 }
 0x23a   :  { %v421_v51 = vmax.f32 %v413_v49, 0.0 }
 0x23b   :  { %424 = vst [vmem:[#allocation11 + $0x8] sm:$0xff] %v422_v50 }
 0x23c   :  { %423 = vst [vmem:[#allocation11] sm:$0xff] %v421_v51 }
 0x23d   :  { %840 = shalt.err (!%p837_p2)
}
 0x23e   :  { %s841_s16 = scalar_lea.hbm %s1018_s6, 256 }
 0x23f   :  { %p842_p3 = scmp.ne.s32.totalorder %s1018_s6, %s841_s16  ;;  %p845_p4 = scmp.lt.u32.totalorder %s841_s16, %s1018_s6 }
 0x241   :  { %p847_p5 = pnand %p845_p4, %p842_p3 }
 0x243   :  { %850 = shalt.err (!%p847_p5)
}
 0x244   :  { %436 = dma.vmem_to_hbm [thread:$0]  %s431_s13, 256, %s1018_s6, [#allocation4], %s861_s9, %s861_s9, %s862_s10  }
 0x245   :  { %857 = dma.done.wait [#allocation4], 256  }
 0x246   :  { %858 = vsyncadd [#allocation4], 4294967040 }
 0x247   :  { %440 = vsyncpa [#allocation3], 1 }
 0x248   :  { %441 = vsyncpa [#allocation6], 1 }
 0x249   :  { %442 = vsyncpa [#allocation9], 1 }
 0x24a   :  { %443 = vsyncpa [#allocation4], 1 }

</bundles_post_ra>
